<compile_context>
chip_gen: v7x
topology: tpu7x:2x2x1
jax: 0.10.0
libtpu: 0.0.40
codegen_flags: <defaults>
</compile_context>

<pallas_src>
import functools

import jax
import jax.numpy as jnp
from jax.experimental import pallas as pl
from jax.experimental.pallas import tpu as pltpu

HIDDEN_UNITS = 20
H_PAD = 24            # hidden padded to next multiple of 8 (sublane axis)
WB_COLS = 128         # packed parameter slab is (H_PAD, 128): one lane-vreg group
MAX_B_TILE = 4096     # lane-packed batch tile per grid step (sweep 2048/4096/8192)
TILE_QUANTUM = 512    # tile granularity; bounds padding waste for odd batch sizes
SMALL_BATCH = 512     # below this, skip Pallas and let XLA fuse the tiny MLP

# Packed-slab column layout (lanes):
#   [:, 0:H_PAD]      -> W2 (PyTorch (out, in) orientation), zero-padded to H_PAD
#   [:, H_PAD + 0]    -> w1 column   (H, 1) weight of the in_features=1 layer
#   [:, H_PAD + 1]    -> b1 column
#   [:, H_PAD + 2]    -> b2 column
#   [:, H_PAD + 3]    -> w3 column   (layer-3 weight, reduced over sublanes)
#   [0, H_PAD + 4]    -> b3 scalar
_C_W1 = H_PAD + 0
_C_B1 = H_PAD + 1
_C_B2 = H_PAD + 2
_C_W3 = H_PAD + 3
_C_B3 = H_PAD + 4


def _round_up(n, m):
    return ((n + m - 1) // m) * m


def _prefer_two_tiles():
    """True on v7x-class chips (2 TensorCores) where a 2-step parallel grid pays off."""
    try:
        kind = (jax.devices()[0].device_kind or "").lower()
    except Exception:
        return False
    return "v7" in kind


def _mlp_kernel(x_ref, wb_ref, o_ref):
    x = x_ref[...]                                   # (1, BT), batch on lanes

    # Static slices of the packed VMEM parameter slab (free).
    w2 = wb_ref[:, 0:H_PAD]                          # (H_PAD, H_PAD)
    w1 = wb_ref[:, _C_W1:_C_W1 + 1]                  # (H_PAD, 1)
    b1 = wb_ref[:, _C_B1:_C_B1 + 1]                  # (H_PAD, 1)
    b2 = wb_ref[:, _C_B2:_C_B2 + 1]                  # (H_PAD, 1)
    w3 = wb_ref[:, _C_W3:_C_W3 + 1]                  # (H_PAD, 1)
    b3 = wb_ref[0:1, _C_B3:_C_B3 + 1]                # (1, 1)

    # Layer 1: in_features == 1 -> VPU broadcast (outer product), no MXU.
    #   h1[h, b] = relu(w1[h] * x[b] + b1[h])
    h1 = jnp.maximum(w1 * x + b1, 0.0)               # (H_PAD, BT)

    # Layer 2: the only real matmul -> MXU, weights stationary, batch on the lane/N axis.
    h2 = jnp.dot(w2, h1, preferred_element_type=jnp.float32) + b2
    h2 = jnp.maximum(h2, 0.0)                        # (H_PAD, BT)

    # Layer 3: out_features == 1 -> VPU multiply + XLU sublane reduction.
    out = jnp.sum(w3 * h2, axis=0, keepdims=True) + b3   # (1, BT)

    o_ref[...] = out.astype(o_ref.dtype)


@jax.jit
def culture_hunter_forward(x, params):
    """x: (B, 1) float32; params in PyTorch nn.Linear convention. Returns (B, 1)."""
    w1, b1, w2, b2, w3, b3 = params          # (H,1),(H,),(H,H),(H,),(1,H),(1,)
    B = x.shape[0]
    H = w1.shape[0]
    assert H <= H_PAD, f"hidden={H} exceeds H_PAD={H_PAD}"

    # Small-batch fast path: a fused XLA graph beats kernel launch + pad/slice here.
    if B < SMALL_BATCH:
        h1 = jnp.maximum(x @ w1.T + b1, 0.0)
        h2 = jnp.maximum(h1 @ w2.T + b2, 0.0)
        return h2 @ w3.T + b3

    # ---- host-side layout prep (paid once, ~KBs) ------------------------------
    # Batch goes lane-dense: (B, 1) -> (1, B_pad) via a zero-cost reshape.
    b_tile = min(MAX_B_TILE, _round_up(B, TILE_QUANTUM))
    b_pad = _round_up(B, b_tile)
    n_tiles = b_pad // b_tile
    # v7x has 2 TensorCores: give the "parallel" axis >= 2 steps to shard.
    if _prefer_two_tiles() and n_tiles == 1 and b_tile >= 2 * TILE_QUANTUM:
        b_tile //= 2
        n_tiles = 2

    x_row = jnp.pad(x.astype(jnp.float32).reshape(1, B), ((0, 0), (0, b_pad - B)))

    # Pack all parameters into one (H_PAD, 128) slab (zero-padded hidden rows/cols).
    wb = jnp.zeros((H_PAD, WB_COLS), jnp.float32)
    wb = wb.at[:H, 0:H].set(w2.astype(jnp.float32))
    wb = wb.at[:H, _C_W1].set(w1.astype(jnp.float32)[:, 0])
    wb = wb.at[:H, _C_B1].set(b1.astype(jnp.float32))
    wb = wb.at[:H, _C_B2].set(b2.astype(jnp.float32))
    wb = wb.at[:H, _C_W3].set(w3.astype(jnp.float32)[0, :])
    wb = wb.at[0, _C_B3].set(b3.astype(jnp.float32)[0])

    out_row = pl.pallas_call(
        _mlp_kernel,
        out_shape=jax.ShapeDtypeStruct((1, b_pad), jnp.float32),
        grid=(n_tiles,),
        in_specs=[
            pl.BlockSpec((1, b_tile), lambda i: (0, i)),        # x tile (lane-dense)
            pl.BlockSpec((H_PAD, WB_COLS), lambda i: (0, 0)),   # packed params (VMEM-resident)
        ],
        out_specs=pl.BlockSpec((1, b_tile), lambda i: (0, i)),  # y tile (lane-dense)
        compiler_params=pltpu.CompilerParams(
            dimension_semantics=("parallel",),                  # shard batch tiles across TCs
        ),
    )(x_row, wb)

    # Back to the module's (B, 1) contract (reshape, not transpose: zero-cost).
    return out_row[0, :B].reshape(B, 1)


def init_params(key, hidden_units=HIDDEN_UNITS):
    # PyTorch nn.Linear convention: W is (out, in), b is (out,),
    # init uniform +/- 1/sqrt(fan_in).
    ks = jax.random.split(key, 6)

    def lin(kw, kb, fan_in, fan_out):
        bound = 1.0 / jnp.sqrt(jnp.float32(fan_in))
        w = jax.random.uniform(kw, (fan_out, fan_in), jnp.float32, -bound, bound)
        b = jax.random.uniform(kb, (fan_out,), jnp.float32, -bound, bound)
        return w, b

    w1, b1 = lin(ks[0], ks[1], 1, hidden_units)
    w2, b2 = lin(ks[2], ks[3], hidden_units, hidden_units)
    w3, b3 = lin(ks[4], ks[5], hidden_units, 1)
    return (w1, b1, w2, b2, w3, b3)


def reference_forward(x, params):
    # Pure-JAX reference (PyTorch convention: y = x @ W^T + b).
    w1, b1, w2, b2, w3, b3 = params
    h1 = jnp.maximum(x @ w1.T + b1, 0.0)
    h2 = jnp.maximum(h1 @ w2.T + b2, 0.0)
    return h2 @ w3.T + b3


if __name__ == "__main__":
    key = jax.random.PRNGKey(0)
    k_big, k_small, k_p = jax.random.split(key, 3)
    params = init_params(k_p, HIDDEN_UNITS)

    # Kernel path: batch above the small-batch fast-path threshold so the Pallas
    # kernel itself runs (lane-padded to one/two tiles internally).
    B_big = 640
    x_big = jax.random.normal(k_big, (B_big, 1), jnp.float32)
    out_big = jax.block_until_ready(culture_hunter_forward(x_big, params))
    ref_big = reference_forward(x_big, params)
    assert out_big.shape == (B_big, 1)
    assert jnp.allclose(out_big, ref_big, atol=1e-5, rtol=1e-5), (
        f"max abs err {jnp.max(jnp.abs(out_big - ref_big))}"
    )

    # Small-batch fast path (pure fused XLA), still matches the module semantics.
    B_small = 8
    x_small = jax.random.normal(k_small, (B_small, 1), jnp.float32)
    out_small = jax.block_until_ready(culture_hunter_forward(x_small, params))
    ref_small = reference_forward(x_small, params)
    assert out_small.shape == (B_small, 1)
    assert jnp.allclose(out_small, ref_small, atol=1e-5, rtol=1e-5), (
        f"max abs err {jnp.max(jnp.abs(out_small - ref_small))}"
    )

    print("KERNEL_OK")
</pallas_src>

<mosaic_0001>
module attributes {stable_mosaic.version = 11 : i64} {
  func.func @_mlp_kernel(%arg0: i32, %arg1: memref<1x1024xf32, #tpu.memory_space<vmem>>, %arg2: memref<24x128xf32, #tpu.memory_space<vmem>>, %arg3: memref<1x1024xf32, #tpu.memory_space<vmem>>) attributes {dimension_semantics = [#tpu.dimension_semantics<parallel>], iteration_bounds = array<i64: 1>, scalar_prefetch = 0 : i64, scratch_operands = 0 : i64, tpu.core_type = #tpu.core_type<tc>, window_params = [{transform_indices = @transform_0, window_bounds = array<i64: 1, 1024>}, {pipeline_mode = #tpu.pipeline_mode<synchronous>, transform_indices = @transform_1, window_bounds = array<i64: 24, 128>}, {transform_indices = @transform_2, window_bounds = array<i64: 1, 1024>}]} {
    %c0 = arith.constant 0 : index
    %c0_0 = arith.constant 0 : index
    %0 = vector.load %arg1[%c0, %c0_0] : memref<1x1024xf32, #tpu.memory_space<vmem>>, vector<1x1024xf32>
    %c0_1 = arith.constant 0 : index
    %c0_2 = arith.constant 0 : index
    %1 = vector.load %arg2[%c0_1, %c0_2] : memref<24x128xf32, #tpu.memory_space<vmem>>, vector<24x24xf32>
    %c0_3 = arith.constant 0 : index
    %c24 = arith.constant 24 : index
    %2 = vector.load %arg2[%c0_3, %c24] : memref<24x128xf32, #tpu.memory_space<vmem>>, vector<24x1xf32>
    %c0_4 = arith.constant 0 : index
    %c25 = arith.constant 25 : index
    %3 = vector.load %arg2[%c0_4, %c25] : memref<24x128xf32, #tpu.memory_space<vmem>>, vector<24x1xf32>
    %c0_5 = arith.constant 0 : index
    %c26 = arith.constant 26 : index
    %4 = vector.load %arg2[%c0_5, %c26] : memref<24x128xf32, #tpu.memory_space<vmem>>, vector<24x1xf32>
    %c0_6 = arith.constant 0 : index
    %c27 = arith.constant 27 : index
    %5 = vector.load %arg2[%c0_6, %c27] : memref<24x128xf32, #tpu.memory_space<vmem>>, vector<24x1xf32>
    %c0_7 = arith.constant 0 : index
    %c28 = arith.constant 28 : index
    %6 = vector.load %arg2[%c0_7, %c28] : memref<24x128xf32, #tpu.memory_space<vmem>>, vector<1x1xf32>
    %7 = vector.broadcast %2 : vector<24x1xf32> to vector<24x1024xf32>
    %8 = vector.broadcast %0 : vector<1x1024xf32> to vector<24x1024xf32>
    %9 = arith.mulf %7, %8 : vector<24x1024xf32>
    %10 = vector.broadcast %3 : vector<24x1xf32> to vector<24x1024xf32>
    %11 = arith.addf %9, %10 : vector<24x1024xf32>
    %cst = arith.constant 0.000000e+00 : f32
    %12 = vector.broadcast %cst : f32 to vector<24x1024xf32>
    %13 = arith.maximumf %11, %12 : vector<24x1024xf32>
    %cst_8 = arith.constant dense<0.000000e+00> : vector<24x1024xf32>
    %14 = tpu.matmul %1, %13, %cst_8 {dimension_numbers = #tpu.dot_dimension_numbers<[1], [0], [0], [1], [0, 0, 1, 1], [], []>} : vector<24x24xf32>, vector<24x1024xf32>, vector<24x1024xf32> -> vector<24x1024xf32>
    %15 = vector.broadcast %4 : vector<24x1xf32> to vector<24x1024xf32>
    %16 = arith.addf %14, %15 : vector<24x1024xf32>
    %cst_9 = arith.constant 0.000000e+00 : f32
    %17 = vector.broadcast %cst_9 : f32 to vector<24x1024xf32>
    %18 = arith.maximumf %16, %17 : vector<24x1024xf32>
    %19 = vector.broadcast %5 : vector<24x1xf32> to vector<24x1024xf32>
    %20 = arith.mulf %19, %18 : vector<24x1024xf32>
    %cst_10 = arith.constant dense<0.000000e+00> : vector<1024xf32>
    %21 = vector.multi_reduction <add>, %20, %cst_10 [0] : vector<24x1024xf32> to vector<1024xf32>
    %22 = vector.shape_cast %21 : vector<1024xf32> to vector<1x1024xf32>
    %23 = vector.broadcast %6 : vector<1x1xf32> to vector<1x1024xf32>
    %24 = arith.addf %22, %23 : vector<1x1024xf32>
    %c0_11 = arith.constant 0 : index
    %c0_12 = arith.constant 0 : index
    %25 = vector.load %arg3[%c0_11, %c0_12] : memref<1x1024xf32, #tpu.memory_space<vmem>>, vector<1x1024xf32>
    tpu.vector_store %arg3[%c0_11, %c0_12], %24 {strides = array<i32>} : memref<1x1024xf32, #tpu.memory_space<vmem>>, vector<1x1024xf32>,
    return
  }
  func.func @transform_0(%arg0: i32) -> (i32, i32) {
    %c0_i32 = arith.constant 0 : i32
    %c0_i32_0 = arith.constant 0 : i32
    return %c0_i32, %arg0 : i32, i32
  }
  func.func @transform_1(%arg0: i32) -> (i32, i32) {
    %c0_i32 = arith.constant 0 : i32
    %c0_i32_0 = arith.constant 0 : i32
    %c0_i32_1 = arith.constant 0 : i32
    return %c0_i32, %c0_i32_0 : i32, i32
  }
  func.func @transform_2(%arg0: i32) -> (i32, i32) {
    %c0_i32 = arith.constant 0 : i32
    %c0_i32_0 = arith.constant 0 : i32
    return %c0_i32, %arg0 : i32, i32
  }
}

</mosaic_0001>

<bundles_post_ra>
// kernel: culture_hunter_forward.1
= control target key start
LH: loop header
LB: loop body
LE: loop exit
PB: predicated region body
PF: predicated region fallthrough
CT: control target
= control target key end

     0   :  { %v749_v0 = vmov 25   ;;  %v750_v1 = vmov 24   ;;  %v751_v5 = vmov 0.0   ;;  %v752_v6 = vmov 26   ;;  %s961_s1 = inlined_call_operand.vmem [shape: f32[24,128], index: 1, kind: input, shape index: {}]   ;;  %s962_s0 = inlined_call_operand.vmem [shape: f32[1,1024], index: 0, kind: input, shape index: {}]   ;;  %s963_s2 = inlined_call_operand.vmem [shape: f32[1,1024], index: 2, kind: output, shape index: {}]  }
   0x1   :  { %743 = vset.pattern.permute.xlu1 %v749_v0  ;;  %742 = vset.pattern.permute.xlu0 %v750_v1  ;;  %v774_v2 = vld [vmem:[%s961_s1] sm:$0xff]  ;;  %v781_v3 = vld [vmem:[%s961_s1 + $0x8] sm:$0xff]  ;;  %v788_v4 = vld [vmem:[%s961_s1 + $0x10] sm:$0xff]  ;;  %v753_v7 = vmov 27   ;;  %v754_v9 = vmov 28   ;;  %v32_v10 = vlaneseq  ;;  %vm168_vm0 = vcmask 195584  }
   0x2   :  { %97 = vperm.xlu1 %743, %v774_v2   ;;  %18 = vperm.xlu0 %742, %v774_v2   ;;  %v15_v8 = vld [vmem:[%s961_s1] sm:$0x1] }
   0x3   :  { %239 = vmatprep.mubr.f32.mxu0 %v751_v5  ;;  %322 = vmatprep.mubr.f32.mxu1 %v751_v5  ;;  %v803_v11 = vshrl.u32 %v32_v10, 7  ;;  %v11_v16 = vld [vmem:[%s962_s0] sm:$0xff] }
   0x5   :  { %v38_v12 = vsub.s32 1, %v803_v11  ;;  %v46_v13 = vsub.s32 3, %v803_v11  ;;  %v34_v14 = vsub.s32 0, %v803_v11  ;;  %v42_v15 = vsub.s32 2, %v803_v11 }
   0x6   :  { %101 = vperm.xlu1 %743, %v781_v3   ;;  %23 = vperm.xlu0 %742, %v781_v3   ;;  %v54_v17 = vsub.s32 5, %v803_v11  ;;  %v62_v18 = vsub.s32 7, %v803_v11  ;;  %v50_v19 = vsub.s32 4, %v803_v11  ;;  %v58_v20 = vsub.s32 6, %v803_v11 }
   0x7   :  { %v39_v21 = vrot.slane %v11_v16, %v38_v12  ;;  %v47_v22 = vrot.slane %v11_v16, %v46_v13  ;;  %v35_v23 = vrot.slane %v11_v16, %v34_v14  ;;  %v43_v24 = vrot.slane %v11_v16, %v42_v15 }
   0x8   :  { %v816_v25 = vrot.slane %v11_v16, %v54_v17  ;;  %v818_v26 = vrot.slane %v11_v16, %v62_v18  ;;  %v820_v27 = vrot.slane %v11_v16, %v50_v19  ;;  %v822_v28 = vrot.slane %v11_v16, %v58_v20 }
   0xa   :  { %105 = vperm.xlu1 %743, %v788_v4   ;;  %28 = vperm.xlu0 %742, %v788_v4  }
   0xe   :  { %745 = vset.pattern.permute.xlu1 %v752_v6  ;;  %744 = vset.pattern.permute.xlu0 %v752_v6 }
   0xf   :  { %161 = vperm.xlu1 %745, %v781_v3   ;;  %157 = vperm.xlu0 %744, %v774_v2  }
  0x13   :  { %165 = vperm.xlu1 %745, %v788_v4   ;;  %746 = vset.pattern.permute.xlu0 %v753_v7 }
  0x14   :  { %532 = vperm.xlu0 %746, %v774_v2  }
  0x17   :  { %747 = vset.pattern.permute.xlu1 %v753_v7 }
  0x18   :  { %536 = vperm.xlu1 %747, %v781_v3   ;;  %748 = vset.pattern.permute.xlu0 %v754_v9 }
  0x19   :  { %633 = vperm.xlu0 %748, %v15_v8  }
  0x1c   :  { %540 = vperm.xlu1 %747, %v788_v4  }
  0x81   :  { %v98_v29 = vpop.permute.xlu1 %97  ;;  %v19_v30 = vpop.permute.xlu0 %18 }
  0x82   :  { %v73_v31 = vmul.f32 %v39_v21, %v19_v30  ;;  %v75_v32 = vmul.f32 %v47_v22, %v19_v30  ;;  %v72_v33 = vmul.f32 %v35_v23, %v19_v30  ;;  %v74_v34 = vmul.f32 %v43_v24, %v19_v30 }
  0x83   :  { %v77_v35 = vmul.f32 %v816_v25, %v19_v30  ;;  %v79_v36 = vmul.f32 %v818_v26, %v19_v30  ;;  %v76_v37 = vmul.f32 %v820_v27, %v19_v30  ;;  %v78_v38 = vmul.f32 %v822_v28, %v19_v30 }
  0x84   :  { %v109_v39 = vadd.f32 %v98_v29, %v73_v31  ;;  %v111_v40 = vadd.f32 %v98_v29, %v75_v32  ;;  %v108_v41 = vadd.f32 %v98_v29, %v72_v33  ;;  %v110_v42 = vadd.f32 %v98_v29, %v74_v34 }
  0x85   :  { %v828_v43 = vpop.permute.xlu1 %101  ;;  %v24_v44 = vpop.permute.xlu0 %23  ;;  %v113_v45 = vadd.f32 %v98_v29, %v77_v35  ;;  %v830_v46 = vadd.f32 %v98_v29, %v79_v36  ;;  %v832_v49 = vadd.f32 %v98_v29, %v76_v37  ;;  %v834_v50 = vadd.f32 %v98_v29, %v78_v38 }
  0x86   :  { %v81_v47 = vmul.f32 %v39_v21, %v24_v44  ;;  %v83_v48 = vmul.f32 %v47_v22, %v24_v44  ;;  %v133_v51 = vmax.f32 %v109_v39, 0.0  ;;  %v135_v52 = vmax.f32 %v111_v40, 0.0 }
  0x87   :  { %v80_v53 = vmul.f32 %v35_v23, %v24_v44  ;;  %v82_v54 = vmul.f32 %v43_v24, %v24_v44  ;;  %v132_v57 = vmax.f32 %v108_v41, 0.0  ;;  %v134_v58 = vmax.f32 %v110_v42, 0.0 }
  0x88   :  { %v117_v55 = vadd.f32 %v828_v43, %v81_v47  ;;  %v119_v56 = vadd.f32 %v828_v43, %v83_v48  ;;  %v85_v62 = vmul.f32 %v816_v25, %v24_v44  ;;  %v87_v63 = vmul.f32 %v818_v26, %v24_v44 }
  0x89   :  { %v29_v59 = vpop.permute.xlu0 %28  ;;  %v116_v60 = vadd.f32 %v828_v43, %v80_v53  ;;  %v118_v61 = vadd.f32 %v828_v43, %v82_v54  ;;  %v106_v8 = vpop.permute.xlu1 %105  ;;  %v139_v32 = vmax.f32 %v830_v46, 0.0  ;;  %v84_v33 = vmul.f32 %v820_v27, %v24_v44 }
  0x8a   :  { %v141_v0 = vmax.f32 %v117_v55, 0.0  ;;  %v143_v1 = vmax.f32 %v119_v56, 0.0  ;;  %v89_v6 = vmul.f32 %v39_v21, %v29_v59  ;;  %v91_v7 = vmul.f32 %v47_v22, %v29_v59 }
  0x8b   :  { %v140_v9 = vmax.f32 %v116_v60, 0.0  ;;  %v142_v10 = vmax.f32 %v118_v61, 0.0  ;;  %v88_v12 = vmul.f32 %v35_v23, %v29_v59  ;;  %v90_v13 = vmul.f32 %v43_v24, %v29_v59 }
  0x8c   :  { %v719_v14 = vpack.c.bf16 %v141_v0, %v133_v51  ;;  %v723_v15 = vpack.c.bf16 %v143_v1, %v135_v52  ;;  %v125_v16 = vadd.f32 %v106_v8, %v89_v6  ;;  %v127_v17 = vadd.f32 %v106_v8, %v91_v7 }
  0x8d   :  { %v721_v18 = vpack.c.bf16 %v140_v9, %v132_v57  ;;  %v725_v19 = vpack.c.bf16 %v142_v10, %v134_v58  ;;  %v124_v20 = vadd.f32 %v106_v8, %v88_v12  ;;  %v126_v29 = vadd.f32 %v106_v8, %v90_v13 }
  0x8e   :  { %720 = vmatprep.subr.bf16.mxu0 %v719_v14  ;;  %724 = vmatprep.subr.bf16.mxu1 %v723_v15  ;;  %v149_v30 = vmax.f32 %v125_v16, 0.0  ;;  %v151_v31 = vmax.f32 %v127_v17, 0.0  ;;  %v121_v21 = vadd.f32 %v828_v43, %v85_v62  ;;  %v123_v22 = vadd.f32 %v828_v43, %v87_v63  ;;  %v891_v56 = vpop.permute.xlu0 %157 }
  0x8f   :  { %722 = vmatpush1.bf16.msra.mxu0 %v721_v18  ;;  %726 = vmatpush1.bf16.msra.mxu1 %v725_v19  ;;  %v148_v23 = vmax.f32 %v124_v20, 0.0  ;;  %v137_v24 = vmax.f32 %v113_v45, 0.0  ;;  %v150_v34 = vmax.f32 %v126_v29, 0.0  ;;  %v86_v37 = vmul.f32 %v822_v28, %v24_v44 }
  0x90   :  { %179 = vmatprep.subr.mxu0 %v149_v30  ;;  %262 = vmatprep.subr.mxu1 %v151_v31  ;;  %v145_v35 = vmax.f32 %v121_v21, 0.0  ;;  %v147_v36 = vmax.f32 %v123_v22, 0.0  ;;  %v120_v38 = vadd.f32 %v828_v43, %v84_v33  ;;  %v93_v39 = vmul.f32 %v816_v25, %v29_v59 }
  0x91   :  { %v95_v40 = vmul.f32 %v818_v26, %v29_v59  ;;  %v92_v41 = vmul.f32 %v820_v27, %v29_v59  ;;  %v136_v45 = vmax.f32 %v832_v49, 0.0  ;;  %v122_v46 = vadd.f32 %v828_v43, %v86_v37 }
  0x92   :  { %v727_v42 = vpack.c.bf16 %v145_v35, %v137_v24  ;;  %v94_v47 = vmul.f32 %v822_v28, %v29_v59  ;;  %v731_v48 = vpack.c.bf16 %v147_v36, %v139_v32  ;;  %v144_v51 = vmax.f32 %v120_v38, 0.0 }
  0x93   :  { %180 = vmatpush1.msra.mxu0 %v148_v23  ;;  %263 = vmatpush1.msra.mxu1 %v150_v34  ;;  %v129_v44 = vadd.f32 %v106_v8, %v93_v39  ;;  %v131_v52 = vadd.f32 %v106_v8, %v95_v40  ;;  %v138_v25 = vmax.f32 %v834_v50, 0.0  ;;  %v146_v26 = vmax.f32 %v122_v46, 0.0  ;;  %v899_v6 = vpop.permute.xlu0 %532 }
  0x94   :  { %707 = vmatmul.mubr.msk.f32.vlgmr.msra.gmra.mrb[0].mxu0 %vm168_vm0, %v774_v2  ;;  %710 = vmatmul.mubr.msk.f32.vlgmr.msra.gmra.mrb[0].mxu1 %vm168_vm0, %v774_v2  ;;  %v729_v27 = vpack.c.bf16 %v144_v51, %v136_v45  ;;  %v128_v43 = vadd.f32 %v106_v8, %v92_v41  ;;  %v130_v53 = vadd.f32 %v106_v8, %v94_v47  ;;  %v755_v60 = vmov 1966171168  }
  0x95   :  { %728 = vmatprep.subr.bf16.mxu0 %v727_v42  ;;  %732 = vmatprep.subr.bf16.mxu1 %v731_v48  ;;  %v733_v28 = vpack.c.bf16 %v146_v26, %v138_v25  ;;  %v153_v49 = vmax.f32 %v129_v44, 0.0  ;;  %v155_v54 = vmax.f32 %v131_v52, 0.0 }
  0x96   :  { %245 = vmatprep.mubr.f32.mxu0 %v751_v5  ;;  %328 = vmatprep.mubr.f32.mxu1 %v751_v5  ;;  %v152_v50 = vmax.f32 %v128_v43, 0.0  ;;  %v154_v55 = vmax.f32 %v130_v53, 0.0 }
  0x97   :  { %730 = vmatpush1.bf16.msra.mxu0 %v729_v27  ;;  %734 = vmatpush1.bf16.msra.mxu1 %v733_v28 }
  0x98   :  { %345 = vmatprep.subr.mxu0 %v153_v49  ;;  %428 = vmatprep.subr.mxu1 %v155_v54 }
  0x99   :  { %708 = vmatmul.mubr.msk.f32.gmra.mrb[2].mxu0 %vm168_vm0, %v781_v3  ;;  %711 = vmatmul.mubr.msk.f32.gmra.mrb[2].mxu1 %vm168_vm0, %v781_v3 }
  0x9a   :  { %251 = vmatprep.mubr.f32.mxu0 %v751_v5  ;;  %334 = vmatprep.mubr.f32.mxu1 %v751_v5 }
  0x9b   :  { %346 = vmatpush1.msra.mxu0 %v152_v50  ;;  %429 = vmatpush1.msra.mxu1 %v154_v55 }
  0x9d   :  { %709 = vmatmul.mubr.msk.f32.gmra.mrb[4].mxu0 %vm168_vm0, %v788_v4  ;;  %712 = vmatmul.mubr.msk.f32.gmra.mrb[4].mxu1 %vm168_vm0, %v788_v4 }
  0x9e   :  { %405 = vmatprep.mubr.f32.mxu0 %v751_v5  ;;  %488 = vmatprep.mubr.f32.mxu1 %v751_v5 }
  0xa1   :  { %713 = vmatmul.mubr.msk.f32.vlgmr.msra.gmra.mrb[6].mxu0 %vm168_vm0, %v774_v2  ;;  %716 = vmatmul.mubr.msk.f32.vlgmr.msra.gmra.mrb[6].mxu1 %vm168_vm0, %v774_v2  ;;  %v889_v2 = vpop.permute.xlu1 %161 }
  0xa2   :  { %411 = vmatprep.mubr.f32.mxu0 %v751_v5  ;;  %494 = vmatprep.mubr.f32.mxu1 %v751_v5 }
  0xa5   :  { %714 = vmatmul.mubr.msk.f32.gmra.mrb[8].mxu0 %vm168_vm0, %v781_v3  ;;  %717 = vmatmul.mubr.msk.f32.gmra.mrb[8].mxu1 %vm168_vm0, %v781_v3  ;;  %v893_v57 = vpop.permute.xlu1 %165  ;;  %v657_v3 = vunpack.c.l.s4 %v755_v60 }
  0xa6   :  { %417 = vmatprep.mubr.f32.mxu0 %v751_v5  ;;  %500 = vmatprep.mubr.f32.mxu1 %v751_v5 }
  0xa7   :  { %v658_v7 = vunpack.c.0.s8 %v657_v3 }
  0xa9   :  { %715 = vmatmul.mubr.msk.f32.gmra.mrb[10].mxu0 %vm168_vm0, %v788_v4  ;;  %718 = vmatmul.mubr.msk.f32.gmra.mrb[10].mxu1 %vm168_vm0, %v788_v4  ;;  %v901_v12 = vpop.permute.xlu1 %536  ;;  %v909_v31 = vsub.s32 %v658_v7, %v803_v11 }
  0xad   :  { %v920_v45 = vpop.permute.xlu1 %540 }
 0x167   :  { %v241_v58 = vpop.f32.mrb[0].mxu0  ;;  %v324_v59 = vpop.f32.mrb[0].mxu1 }
 0x168   :  { %v242_v61 = vadd.f32 %v241_v58, %v891_v56  ;;  %v325_v5 = vadd.f32 %v324_v59, %v891_v56  ;;  %v243_v62 = vpop.f32.mrb[1].mxu0  ;;  %v326_v63 = vpop.f32.mrb[1].mxu1 }
 0x169   :  { %v244_v0 = vadd.f32 %v243_v62, %v891_v56  ;;  %v327_v4 = vadd.f32 %v326_v63, %v891_v56 }
 0x16a   :  { %v507_v1 = vmax.f32 %v242_v61, 0.0  ;;  %v509_v8 = vmax.f32 %v325_v5, 0.0 }
 0x16b   :  { %v508_v9 = vmax.f32 %v244_v0, 0.0  ;;  %v510_v13 = vmax.f32 %v327_v4, 0.0 }
 0x16c   :  { %v247_v10 = vpop.f32.mrb[2].mxu0  ;;  %v330_v15 = vpop.f32.mrb[2].mxu1  ;;  %v543_v29 = vmul.f32 %v899_v6, %v507_v1  ;;  %v545_v23 = vmul.f32 %v899_v6, %v509_v8 }
 0x16d   :  { %v248_v14 = vadd.f32 %v247_v10, %v889_v2  ;;  %v249_v16 = vpop.f32.mrb[3].mxu0  ;;  %v331_v17 = vadd.f32 %v330_v15, %v889_v2  ;;  %v332_v19 = vpop.f32.mrb[3].mxu1  ;;  %v544_v22 = vmul.f32 %v899_v6, %v508_v9  ;;  %v546_v33 = vmul.f32 %v899_v6, %v510_v13 }
 0x16e   :  { %v250_v18 = vadd.f32 %v249_v16, %v889_v2  ;;  %v333_v30 = vadd.f32 %v332_v19, %v889_v2 }
 0x16f   :  { %v515_v20 = vmax.f32 %v248_v14, 0.0  ;;  %v517_v21 = vmax.f32 %v331_v17, 0.0 }
 0x170   :  { %v516_v24 = vmax.f32 %v250_v18, 0.0  ;;  %v253_v32 = vpop.f32.mrb[4].mxu0  ;;  %v518_v34 = vmax.f32 %v333_v30, 0.0  ;;  %v336_v37 = vpop.f32.mrb[4].mxu1 }
 0x171   :  { %v551_v35 = vmul.f32 %v901_v12, %v515_v20  ;;  %v254_v36 = vadd.f32 %v253_v32, %v893_v57  ;;  %v255_v38 = vpop.f32.mrb[5].mxu0  ;;  %v553_v11 = vmul.f32 %v901_v12, %v517_v21  ;;  %v337_v40 = vadd.f32 %v336_v37, %v893_v57  ;;  %v338_v42 = vpop.f32.mrb[5].mxu1 }
 0x172   :  { %v552_v39 = vmul.f32 %v901_v12, %v516_v24  ;;  %v256_v41 = vadd.f32 %v255_v38, %v893_v57  ;;  %v554_v46 = vmul.f32 %v901_v12, %v518_v34  ;;  %v339_v48 = vadd.f32 %v338_v42, %v893_v57 }
 0x173   :  { %v523_v47 = vmax.f32 %v254_v36, 0.0  ;;  %v567_v51 = vadd.f32 %v551_v35, %v543_v29  ;;  %v525_v44 = vmax.f32 %v337_v40, 0.0  ;;  %v583_v26 = vadd.f32 %v553_v11, %v545_v23 }
 0x174   :  { %v524_v52 = vmax.f32 %v256_v41, 0.0  ;;  %v575_v25 = vadd.f32 %v552_v39, %v544_v22  ;;  %v407_v27 = vpop.f32.mrb[6].mxu0  ;;  %v526_v43 = vmax.f32 %v339_v48, 0.0  ;;  %v591_v49 = vadd.f32 %v554_v46, %v546_v33  ;;  %v490_v54 = vpop.f32.mrb[6].mxu1 }
 0x175   :  { %v559_v28 = vmul.f32 %v920_v45, %v523_v47  ;;  %v408_v53 = vadd.f32 %v407_v27, %v891_v56  ;;  %v409_v50 = vpop.f32.mrb[7].mxu0  ;;  %v561_v58 = vmul.f32 %v920_v45, %v525_v44  ;;  %v491_v59 = vadd.f32 %v490_v54, %v891_v56  ;;  %v492_v3 = vpop.f32.mrb[7].mxu1 }
 0x176   :  { %v560_v55 = vmul.f32 %v920_v45, %v524_v52  ;;  %v410_v60 = vadd.f32 %v409_v50, %v891_v56  ;;  %v562_v61 = vmul.f32 %v920_v45, %v526_v43  ;;  %v493_v63 = vadd.f32 %v492_v3, %v891_v56 }
 0x177   :  { %v568_v5 = vadd.f32 %v567_v51, %v559_v28  ;;  %v511_v62 = vmax.f32 %v408_v53, 0.0  ;;  %v584_v4 = vadd.f32 %v583_v26, %v561_v58  ;;  %v513_v1 = vmax.f32 %v491_v59, 0.0 }
 0x178   :  { %v576_v0 = vadd.f32 %v575_v25, %v560_v55  ;;  %v512_v7 = vmax.f32 %v410_v60, 0.0  ;;  %v413_v8 = vpop.f32.mrb[8].mxu0  ;;  %v592_v10 = vadd.f32 %v591_v49, %v562_v61  ;;  %v514_v14 = vmax.f32 %v493_v63, 0.0  ;;  %v496_v15 = vpop.f32.mrb[8].mxu1 }
 0x179   :  { %v569_v9 = vrot.slane %v568_v5, 4  ;;  %v547_v13 = vmul.f32 %v899_v6, %v511_v62  ;;  %v415_v16 = vpop.f32.mrb[9].mxu0  ;;  %v585_v18 = vrot.slane %v584_v4, 4  ;;  %v549_v19 = vmul.f32 %v899_v6, %v513_v1  ;;  %v498_v29 = vpop.f32.mrb[9].mxu1 }
 0x17a   :  { %v577_v17 = vrot.slane %v576_v0, 4  ;;  %v548_v20 = vmul.f32 %v899_v6, %v512_v7  ;;  %v593_v30 = vrot.slane %v592_v10, 4  ;;  %v550_v21 = vmul.f32 %v899_v6, %v514_v14 }
 0x17b   :  { %v570_v56 = vadd.f32 %v569_v9, %v568_v5  ;;  %v414_v22 = vadd.f32 %v413_v8, %v889_v2  ;;  %v586_v24 = vadd.f32 %v585_v18, %v584_v4  ;;  %v497_v32 = vadd.f32 %v496_v15, %v889_v2 }
 0x17c   :  { %v578_v23 = vadd.f32 %v577_v17, %v576_v0  ;;  %v416_v33 = vadd.f32 %v415_v16, %v889_v2  ;;  %v419_v34 = vpop.f32.mrb[10].mxu0  ;;  %v594_v35 = vadd.f32 %v593_v30, %v592_v10  ;;  %v499_v37 = vadd.f32 %v498_v29, %v889_v2  ;;  %v502_v39 = vpop.f32.mrb[10].mxu1 }
 0x17d   :  { %v519_v36 = vmax.f32 %v414_v22, 0.0  ;;  %v420_v38 = vadd.f32 %v419_v34, %v893_v57  ;;  %v421_v11 = vpop.f32.mrb[11].mxu0  ;;  %v521_v40 = vmax.f32 %v497_v32, 0.0  ;;  %v503_v6 = vadd.f32 %v502_v39, %v893_v57  ;;  %v504_v46 = vpop.f32.mrb[11].mxu1 }
 0x17e   :  { %v520_v41 = vmax.f32 %v416_v33, 0.0  ;;  %v422_v42 = vadd.f32 %v421_v11, %v893_v57  ;;  %v522_v48 = vmax.f32 %v499_v37, 0.0  ;;  %v505_v44 = vadd.f32 %v504_v46, %v893_v57 }
 0x17f   :  { %v555_v47 = vmul.f32 %v901_v12, %v519_v36  ;;  %v527_v51 = vmax.f32 %v420_v38, 0.0  ;;  %v557_v52 = vmul.f32 %v901_v12, %v521_v40  ;;  %v529_v25 = vmax.f32 %v503_v6, 0.0 }
 0x180   :  { %v556_v2 = vmul.f32 %v901_v12, %v520_v41  ;;  %v528_v26 = vmax.f32 %v422_v42, 0.0  ;;  %v558_v43 = vmul.f32 %v901_v12, %v522_v48  ;;  %v530_v49 = vmax.f32 %v505_v44, 0.0 }
 0x181   :  { %v599_v27 = vadd.f32 %v555_v47, %v547_v13  ;;  %v563_v28 = vmul.f32 %v920_v45, %v527_v51  ;;  %v615_v53 = vadd.f32 %v557_v52, %v549_v19  ;;  %v565_v50 = vmul.f32 %v920_v45, %v529_v25 }
 0x182   :  { %v607_v54 = vadd.f32 %v556_v2, %v548_v20  ;;  %v564_v55 = vmul.f32 %v920_v45, %v528_v26  ;;  %v623_v58 = vadd.f32 %v558_v43, %v550_v21  ;;  %v566_v59 = vmul.f32 %v920_v45, %v530_v49  ;;  %v634_v45 = vpop.permute.xlu0 %633 }
 0x183   :  { %v600_v57 = vadd.f32 %v599_v27, %v563_v28  ;;  %v571_v60 = vrot.slane %v570_v56, 2  ;;  %v616_v3 = vadd.f32 %v615_v53, %v565_v50  ;;  %v579_v5 = vrot.slane %v578_v23, 2 }
 0x184   :  { %v608_v61 = vadd.f32 %v607_v54, %v564_v55  ;;  %v587_v62 = vrot.slane %v586_v24, 2  ;;  %v624_v12 = vadd.f32 %v623_v58, %v566_v59  ;;  %v595_v4 = vrot.slane %v594_v35, 2 }
 0x185   :  { %v601_v63 = vrot.slane %v600_v57, 4  ;;  %v572_v0 = vadd.f32 %v571_v60, %v570_v56  ;;  %v617_v1 = vrot.slane %v616_v3, 4  ;;  %v580_v8 = vadd.f32 %v579_v5, %v578_v23 }
 0x186   :  { %v609_v7 = vrot.slane %v608_v61, 4  ;;  %v588_v9 = vadd.f32 %v587_v62, %v586_v24  ;;  %v625_v13 = vrot.slane %v624_v12, 4  ;;  %v596_v15 = vadd.f32 %v595_v4, %v594_v35 }
 0x187   :  { %v602_v10 = vadd.f32 %v601_v63, %v600_v57  ;;  %v573_v14 = vrot.slane %v572_v0, 1  ;;  %v618_v16 = vadd.f32 %v617_v1, %v616_v3  ;;  %v581_v18 = vrot.slane %v580_v8, 1 }
 0x188   :  { %v610_v17 = vadd.f32 %v609_v7, %v608_v61  ;;  %v589_v19 = vrot.slane %v588_v9, 1  ;;  %v626_v29 = vadd.f32 %v625_v13, %v624_v12  ;;  %v597_v21 = vrot.slane %v596_v15, 1 }
 0x189   :  { %v603_v20 = vrot.slane %v602_v10, 2  ;;  %v574_v30 = vadd.f32 %v573_v14, %v572_v0  ;;  %v619_v22 = vrot.slane %v618_v16, 2  ;;  %v582_v32 = vadd.f32 %v581_v18, %v580_v8 }
 0x18a   :  { %v611_v56 = vrot.slane %v610_v17, 2  ;;  %v590_v33 = vadd.f32 %v589_v19, %v588_v9  ;;  %v627_v23 = vrot.slane %v626_v29, 2  ;;  %v598_v24 = vadd.f32 %v597_v21, %v596_v15 }
 0x18b   :  { %v604_v34 = vadd.f32 %v603_v20, %v602_v10  ;;  %v636_v36 = vadd.f32 %v634_v45, %v574_v30  ;;  %v620_v37 = vadd.f32 %v619_v22, %v618_v16  ;;  %v637_v35 = vadd.f32 %v634_v45, %v582_v32 }
 0x18c   :  { %v612_v38 = vadd.f32 %v611_v56, %v610_v17  ;;  %v638_v39 = vadd.f32 %v634_v45, %v590_v33  ;;  %v628_v40 = vadd.f32 %v627_v23, %v626_v29  ;;  %v639_v41 = vadd.f32 %v634_v45, %v598_v24 }
 0x18d   :  { %v605_v11 = vrot.slane %v604_v34, 1  ;;  %v621_v6 = vrot.slane %v620_v37, 1  ;;  %v652_v46 = vcombine.low %v636_v36, %v637_v35 }
 0x18e   :  { %v613_v42 = vrot.slane %v612_v38, 1  ;;  %v629_v48 = vrot.slane %v628_v40, 1  ;;  %v653_v51 = vcombine.low %v638_v39, %v639_v41 }
 0x18f   :  { %v606_v47 = vadd.f32 %v605_v11, %v604_v34  ;;  %v622_v44 = vadd.f32 %v621_v6, %v620_v37  ;;  %v662_v2 = vrot.slane %v652_v46, %v909_v31 }
 0x190   :  { %v614_v52 = vadd.f32 %v613_v42, %v612_v38  ;;  %v630_v25 = vadd.f32 %v629_v48, %v628_v40  ;;  %v669_v27 = vrot.slane %v653_v51, %v909_v31 }
 0x191   :  { %v640_v26 = vadd.f32 %v634_v45, %v606_v47  ;;  %v642_v28 = vadd.f32 %v634_v45, %v622_v44 }
 0x192   :  { %v641_v43 = vadd.f32 %v634_v45, %v614_v52  ;;  %v643_v49 = vadd.f32 %v634_v45, %v630_v25  ;;  %v684_v53 = vcombine.low %v662_v2, %v669_v27 }
 0x194   :  { %v654_v54 = vcombine.low %v640_v26, %v641_v43  ;;  %v655_v50 = vcombine.low %v642_v28, %v643_v49  ;;  %v692_v59 = vrot.slane %v684_v53, %v909_v31 }
 0x196   :  { %v676_v55 = vrot.slane %v654_v54, %v909_v31  ;;  %v683_v58 = vrot.slane %v655_v50, %v909_v31 }
 0x198   :  { %v685_v57 = vcombine.low %v676_v55, %v683_v58 }
 0x19a   :  { %v699_v60 = vrot.slane %v685_v57, %v909_v31 }
 0x19c   :  { %v700_v3 = vcombine.low %v692_v59, %v699_v60 }
 0x19e   :  { %702 = vst [vmem:[%s963_s2] sm:$0xff] %v700_v3 }

</bundles_post_ra>
